<compile_context>
chip_gen: v5e
topology: v5e:2x2
jax: 0.10.0
libtpu: 0.0.40
codegen_flags: <defaults>
</compile_context>

<pallas_src>
import jax
import jax.numpy as jnp
from jax.experimental import pallas as pl
from jax.experimental.pallas import tpu as pltpu


def _round_up(a, b):
    return ((a + b - 1) // b) * b


def _make_gcn_kernel(is_relu: bool):
    def gcn_kernel(adj_ref, x_ref, o_ref, acc_ref):
        # adj_ref: (TM, TK)  x_ref: (TK, H)  o_ref: (TM, H)  acc_ref: (TM, H) f32
        k = pl.program_id(2)

        @pl.when(k == 0)
        def _():
            acc_ref[...] = jnp.zeros_like(acc_ref)

        acc_ref[...] += jnp.dot(
            adj_ref[...], x_ref[...], preferred_element_type=jnp.float32
        )

        @pl.when(k == pl.num_programs(2) - 1)
        def _():
            out = acc_ref[...]
            if is_relu:
                out = jnp.maximum(out, 0.0)
            o_ref[...] = out.astype(o_ref.dtype)

    return gcn_kernel


def gcn_forward(x, adj, is_relu=True, *, compute_dtype=jnp.bfloat16):
    """Pallas implementation of GCN.forward(x, adj, is_relu)."""
    B, N, H = x.shape
    assert adj.shape == (B, N, N)
    out_dtype = x.dtype

    # Lane-dense hidden dim; MXU-friendly node-dim tiles (256 on v6e/v7x-sized
    # problems when it divides cleanly, 128 otherwise — both fine on v5e).
    H_pad = _round_up(max(H, 128), 128)
    n128 = _round_up(max(N, 128), 128)
    tile_n = 256 if (n128 % 256 == 0) else 128
    N_pad = _round_up(n128, tile_n)
    tm = tk = tile_n

    # bf16 feed (halves HBM traffic on adj/x), f32 accumulation in-kernel.
    adj_c = adj.astype(compute_dtype)
    x_c = x.astype(compute_dtype)
    if N_pad != N:
        adj_c = jnp.pad(adj_c, ((0, 0), (0, N_pad - N), (0, N_pad - N)))
        x_c = jnp.pad(x_c, ((0, 0), (0, N_pad - N), (0, 0)))
    if H_pad != H:
        x_c = jnp.pad(x_c, ((0, 0), (0, 0), (0, H_pad - H)))

    kernel = _make_gcn_kernel(bool(is_relu))
    grid = (B, N_pad // tm, N_pad // tk)

    out = pl.pallas_call(
        kernel,
        out_shape=jax.ShapeDtypeStruct((B, N_pad, H_pad), out_dtype),
        grid_spec=pltpu.PrefetchScalarGridSpec(
            num_scalar_prefetch=0,
            grid=grid,
            in_specs=[
                # adj tile: (TM, TK) at block (i, k)
                pl.BlockSpec((pl.Squeezed(), tm, tk), lambda b, i, k: (b, i, k)),
                # x tile: (TK, H) at block (k, 0)
                pl.BlockSpec((pl.Squeezed(), tk, H_pad), lambda b, i, k: (b, k, 0)),
            ],
            # out tile resident across the K axis (accumulator pattern)
            out_specs=pl.BlockSpec(
                (pl.Squeezed(), tm, H_pad), lambda b, i, k: (b, i, 0)
            ),
            scratch_shapes=[pltpu.VMEM((tm, H_pad), jnp.float32)],
        ),
        compiler_params=pltpu.CompilerParams(
            dimension_semantics=("parallel", "parallel", "arbitrary"),
        ),
    )(adj_c, x_c)

    return out[:, :N, :H]


if __name__ == "__main__":
    # Small deterministic example: batch=2, nodes=64, hidden=128
    B, N, H = 2, 64, 128
    key = jax.random.PRNGKey(0)
    kx, ka = jax.random.split(key)
    x = jax.random.normal(kx, (B, N, H), dtype=jnp.float32)
    adj = jax.random.normal(ka, (B, N, N), dtype=jnp.float32)

    out = gcn_forward(x, adj, is_relu=True)
    out = jax.block_until_ready(out)

    # Reference with matching bf16 compute precision (f32 accumulation).
    ref = jnp.einsum(
        "bij,bjh->bih",
        adj.astype(jnp.bfloat16),
        x.astype(jnp.bfloat16),
        preferred_element_type=jnp.float32,
    )
    ref = jnp.maximum(ref, 0.0).astype(x.dtype)

    assert out.shape == (B, N, H)
    assert jnp.allclose(out, ref, atol=1e-2, rtol=1e-2), float(
        jnp.max(jnp.abs(out - ref))
    )

    print("KERNEL_OK")
</pallas_src>

<mosaic_0001>
module attributes {stable_mosaic.version = 11 : i64} {
  func.func @gcn_kernel(%arg0: i32, %arg1: i32, %arg2: i32, %arg3: memref<1x128x128xbf16, #tpu.memory_space<vmem>>, %arg4: memref<1x128x128xbf16, #tpu.memory_space<vmem>>, %arg5: memref<1x128x128xf32, #tpu.memory_space<vmem>>, %arg6: memref<128x128xf32, #tpu.memory_space<vmem>>) attributes {dimension_semantics = [#tpu.dimension_semantics<parallel>, #tpu.dimension_semantics<parallel>, #tpu.dimension_semantics<arbitrary>], iteration_bounds = array<i64: 2, 1, 1>, scalar_prefetch = 0 : i64, scratch_operands = 1 : i64, tpu.core_type = #tpu.core_type<tc>, window_params = [{transform_indices = @transform_0, window_bounds = array<i64: 1, 128, 128>}, {transform_indices = @transform_1, window_bounds = array<i64: 1, 128, 128>}, {transform_indices = @transform_2, window_bounds = array<i64: 1, 128, 128>}]} {
    %c0_i32 = arith.constant 0 : i32
    %0 = arith.cmpi eq, %arg2, %c0_i32 : i32
    %1 = arith.extui %0 : i1 to i32
    %c0_i32_0 = arith.constant 0 : i32
    %2 = arith.cmpi ne, %1, %c0_i32_0 : i32
    scf.if %2 {
      %cst_12 = arith.constant 0.000000e+00 : f32
      %14 = vector.broadcast %cst_12 : f32 to vector<128x128xf32>
      %c0_13 = arith.constant 0 : index
      %c0_14 = arith.constant 0 : index
      %15 = vector.load %arg6[%c0_13, %c0_14] : memref<128x128xf32, #tpu.memory_space<vmem>>, vector<128x128xf32>
      tpu.vector_store %arg6[%c0_13, %c0_14], %14 {strides = array<i32>} : memref<128x128xf32, #tpu.memory_space<vmem>>, vector<128x128xf32>,
    } else {
    }
    %c0 = arith.constant 0 : index
    %c0_1 = arith.constant 0 : index
    %3 = vector.load %arg6[%c0, %c0_1] : memref<128x128xf32, #tpu.memory_space<vmem>>, vector<128x128xf32>
    %c0_2 = arith.constant 0 : index
    %c0_3 = arith.constant 0 : index
    %c0_4 = arith.constant 0 : index
    %4 = vector.load %arg3[%c0_2, %c0_3, %c0_4] : memref<1x128x128xbf16, #tpu.memory_space<vmem>>, vector<1x128x128xbf16>
    %5 = vector.shape_cast %4 : vector<1x128x128xbf16> to vector<128x128xbf16>
    %c0_5 = arith.constant 0 : index
    %c0_6 = arith.constant 0 : index
    %c0_7 = arith.constant 0 : index
    %6 = vector.load %arg4[%c0_5, %c0_6, %c0_7] : memref<1x128x128xbf16, #tpu.memory_space<vmem>>, vector<1x128x128xbf16>
    %7 = vector.shape_cast %6 : vector<1x128x128xbf16> to vector<128x128xbf16>
    %cst = arith.constant dense<0.000000e+00> : vector<128x128xf32>
    %8 = tpu.matmul %5, %7, %cst {dimension_numbers = #tpu.dot_dimension_numbers<[1], [0], [0], [1], [0, 0, 1, 1], [], []>} : vector<128x128xbf16>, vector<128x128xbf16>, vector<128x128xf32> -> vector<128x128xf32>
    %9 = arith.addf %3, %8 : vector<128x128xf32>
    %c0_8 = arith.constant 0 : index
    %c0_9 = arith.constant 0 : index
    %10 = vector.load %arg6[%c0_8, %c0_9] : memref<128x128xf32, #tpu.memory_space<vmem>>, vector<128x128xf32>
    tpu.vector_store %arg6[%c0_8, %c0_9], %9 {strides = array<i32>} : memref<128x128xf32, #tpu.memory_space<vmem>>, vector<128x128xf32>,
    %c0_i32_10 = arith.constant 0 : i32
    %11 = arith.cmpi eq, %arg2, %c0_i32_10 : i32
    %12 = arith.extui %11 : i1 to i32
    %c0_i32_11 = arith.constant 0 : i32
    %13 = arith.cmpi ne, %12, %c0_i32_11 : i32
    scf.if %13 {
      %c0_12 = arith.constant 0 : index
      %c0_13 = arith.constant 0 : index
      %14 = vector.load %arg6[%c0_12, %c0_13] : memref<128x128xf32, #tpu.memory_space<vmem>>, vector<128x128xf32>
      %cst_14 = arith.constant 0.000000e+00 : f32
      %15 = vector.broadcast %cst_14 : f32 to vector<128x128xf32>
      %16 = arith.maximumf %14, %15 : vector<128x128xf32>
      %c0_15 = arith.constant 0 : index
      %c0_16 = arith.constant 0 : index
      %c0_17 = arith.constant 0 : index
      %17 = vector.load %arg5[%c0_15, %c0_16, %c0_17] : memref<1x128x128xf32, #tpu.memory_space<vmem>>, vector<1x128x128xf32>
      %18 = vector.shape_cast %17 : vector<1x128x128xf32> to vector<128x128xf32>
      %19 = vector.shape_cast %16 : vector<128x128xf32> to vector<1x128x128xf32>
      tpu.vector_store %arg5[%c0_15, %c0_16, %c0_17], %19 {strides = array<i32>} : memref<1x128x128xf32, #tpu.memory_space<vmem>>, vector<1x128x128xf32>,
    } else {
    }
    return
  }
  func.func @transform_0(%arg0: i32, %arg1: i32, %arg2: i32) -> (i32, i32, i32) {
    %c0_i32 = arith.constant 0 : i32
    return %arg0, %arg1, %arg2 : i32, i32, i32
  }
  func.func @transform_1(%arg0: i32, %arg1: i32, %arg2: i32) -> (i32, i32, i32) {
    %c0_i32 = arith.constant 0 : i32
    %c0_i32_0 = arith.constant 0 : i32
    return %arg0, %arg2, %c0_i32 : i32, i32, i32
  }
  func.func @transform_2(%arg0: i32, %arg1: i32, %arg2: i32) -> (i32, i32, i32) {
    %c0_i32 = arith.constant 0 : i32
    %c0_i32_0 = arith.constant 0 : i32
    return %arg0, %arg1, %c0_i32 : i32, i32, i32
  }
}

</mosaic_0001>

<bundles_post_ra>
// kernel: tpu_custom_call.1
= control target key start
LH: loop header
LB: loop body
LE: loop exit
PB: predicated region body
PF: predicated region fallthrough
CT: control target
= control target key end

     0   :  { %7 = vsyncpa [#allocation4], 0  ;;  %s1217_s0 = inlined_call_operand.hbm [shape: bf16[2,128,128], index: 0, kind: input, shape index: {}]   ;;  %s1218_s1 = inlined_call_operand.hbm [shape: bf16[2,128,128], index: 1, kind: input, shape index: {}]   ;;  %s1219_s2 = inlined_call_operand.hbm [shape: f32[2,128,128], index: 2, kind: output, shape index: {}]  }
   0x1   :  { %9 = vsyncpa [#allocation4 + $0x1], 0 }
   0x2   :  { %10 = vsyncpa [#allocation7], 0 }
   0x3   :  { %12 = vsyncpa [#allocation7 + $0x1], 0 }
   0x4   :  { %13 = vsyncpa [#allocation5], 0 }
   0x5   :  { %15 = vsyncpa [#allocation5 + $0x1], 0  ;;  %s1036_s9 = smov 0   ;;  %s1038_s10 = smov 0  }
   0x6   :  { %s1040_s11 = smov 0   ;;  %s1042_s12 = smov 0  }
   0x7   :  { %s1044_s13 = smov 0   ;;  %s1046_s14 = smov 0  }
   0x8 LB: > { %s672_s15 = sadd.s32 4294967295, %s1015_s14   ;;  %s673_s16 = sadd.s32 4294967294, %s1015_s14   ;;  %s1015_s14 = sphi %s1046_s14, %s21_s14   ;;  %s1011_s13 = sphi %s1044_s13, %s1229_s13   ;;  %s1007_s12 = sphi %s1042_s12, %s1228_s12   ;;  %s1003_s11 = sphi %s1040_s11, %s1227_s11   ;;  %s999_s10 = sphi %s1038_s10, %s1226_s10   ;;  %s995_s9 = sphi %s1036_s9, %s1225_s9  }
   0x9   : > { %s40_s17 = sadd.s32 1, %s1011_s13  ;;  %s51_s18 = sadd.s32 1, %s1003_s11 }
   0xa   : > { %p42_p0 = scmp.ge.s32.totalorder %s40_s17, 2  ;;  %p58_p1 = scmp.ne.s32.totalorder %s1003_s11, %s999_s10 }
   0xb   : > { %p59_p2 = scmp.eq.s32.totalorder %s1015_s14, 0  ;;  %p64_p3 = scmp.ne.s32.totalorder %s999_s10, %s995_s9 }
   0xc   : > { %s1231_s17 = smov (%p42_p0, %s40_s17), 0  ;;  %p65_p5 = scmp.eq.s32.totalorder %s672_s15, 0 }
   0xd   : > { %p1077_p4 = por %p59_p2, %p58_p1  ;;  %s44_s20 = ssub.s32 %s1011_s13, %s1231_s17 }
   0xe   : > { %p118_p6 = scmp.eq.s32.totalorder %s672_s15, 1  ;;  %p49_p7 = scmp.eq.s32.totalorder %s44_s20, 0 }
   0xf   : > { %p1083_p8 = por %p65_p5, %p64_p3  ;;  %p124_p10 = scmp.eq.s32.totalorder %s673_s16, 1 }
  0x10   : > { %p1087_p9 = por %p118_p6, %p58_p1  ;;  %p675_p12 = scmp.ge.s32.totalorder %s1015_s14, 2 }
  0x11   : > { %s1092_s23 = scalar_select %p49_p7, %s1003_s11, %s51_s18  }
  0x12   : > { %p1094_p11 = por %p124_p10, %p64_p3  ;;  %p815_p13 = scmp.lt.s32.totalorder %s1015_s14, 2 }
  0x13   : > { %s1101_s25 = sand.u32 1, %s1003_s11   ;;  %s755_s27 = sshll.u32 %s1011_s13, 6 }
  0x14   : > { %s676_s26 = sshll.u32 %s1101_s25, 6  ;;  %s156_s30 = scalar_lea.hbm %s1217_s0, %s755_s27 }
  0x15   : > { %s148_s3 = scalar_lea.vmem [#allocation3], %s676_s26  ;;  %s157_s5 = sshll.u32 %s156_s30, 4  ;;  %s158_s5 = int_to_ptr.hbm [resolvable:$true] %s157_s5 }
  0x16   : > { %s159_s4 = sshll.u32 %s148_s3, 4  ;;  %p1110_p0 = pnand %p815_p13, %p1077_p4  ;;  %s160_s4 = int_to_ptr.vmem [resolvable:$true] %s159_s4 }
  0x17   : > { %p682_p1 = scmp.ge.s32.totalorder %s1015_s14, 1  ;;  %s145_s7 = scalar_lea.sflag [#allocation4], %s1101_s25 }
  0x18   : > { %s1017_s8 = smov 64   ;;  %s1018_s15 = smov 4  }
  0x19   : > { %807 = dma.hbm_to_vmem [thread:$0]  (!%p1110_p0), %s158_s5, 1024, %s160_s4, %s145_s7, %s1017_s8, %s1017_s8, %s1018_s15  }
  0x1a   : > { %p191_p2 = scmp.lt.s32.totalorder %s1015_s14, 3  ;;  %s180_s20 = scalar_lea.hbm %s1218_s1, %s755_s27 }
  0x1b   : > { %s181_s28 = sshll.u32 %s180_s20, 4  ;;  %s173_s19 = scalar_lea.vmem [#allocation6], %s676_s26  ;;  %s182_s28 = int_to_ptr.hbm [resolvable:$true] %s181_s28 }
  0x1c   : > { %p192_p3 = pnand %p682_p1, %p191_p2  ;;  %s183_s29 = sshll.u32 %s173_s19, 4  ;;  %s184_s29 = int_to_ptr.vmem [resolvable:$true] %s183_s29 }
  0x1d   : > { %s170_s30 = scalar_lea.sflag [#allocation7], %s1101_s25  ;;  %s1126_s3 = sand.u32 (!%p192_p3), 1, %s999_s10  }
  0x1e   : > { %810 = dma.hbm_to_vmem [thread:$0]  (!%p1110_p0), %s182_s28, 1024, %s184_s29, %s170_s30, %s1017_s8, %s1017_s8, %s1018_s15  }
  0x1f   : > { %195 = sbr.rel (%p192_p3) target bundleno = 235 (0xeb), region = 28  ;;  %s683_s4 = sshll.u32 (!%p192_p3), %s1126_s3, 6 }
  0x20   : > { %s198_s5 = scalar_lea.sflag (!%p192_p3), [#allocation4], %s1126_s3  ;;  %s1130_s7 = scalar_lea.vmem (!%p192_p3), [#allocation3], %s683_s4 }
  0x24   : > { %982 = dma.done.wait (%p1083_p8), %s198_s5, 1024  }
  0x25   : > { %984 = vsyncadd (%p1083_p8), %s198_s5, 4294966272  ;;  %s208_s25 = scalar_lea.sflag [#allocation7], %s1126_s3  ;;  %s1137_s26 = scalar_lea.vmem [#allocation6], %s683_s4 }
  0x26   : > { %986 = dma.done.wait (%p1083_p8), %s208_s25, 1024  }
  0x27   : > { %988 = vsyncadd (%p1083_p8), %s208_s25, 4294966272  ;;  %v772_v0 = vld [vmem:[%s1137_s26 + $0x38] sm:$0xff]  ;;  %v771_v1 = vld [vmem:[%s1137_s26 + $0x30] sm:$0xff]  ;;  %s685_s21 = sshll.u32 %s1126_s3, 7  ;;  %s773_s6 = sshll.u32 %s1007_s12, 7 }
  0x28   : > { %405 = vmatpush.bf16.msra.mxu0 %v772_v0  ;;  %774 = vmatpush.bf16.msra.mxu1 %v772_v0  ;;  %v770_v2 = vld [vmem:[%s1137_s26 + $0x28] sm:$0xff]  ;;  %v769_v3 = vld [vmem:[%s1137_s26 + $0x20] sm:$0xff]  ;;  %v768_v4 = vld [vmem:[%s1137_s26 + $0x18] sm:$0xff]  ;;  %s1160_s27 = scalar_lea.vmem [#allocation8], %s685_s21  ;;  %s551_s16 = scalar_lea.hbm %s1219_s2, %s773_s6 }
  0x29   : > { %775 = vmatpush.bf16.msra.mxu2 %v772_v0  ;;  %776 = vmatpush.bf16.msra.mxu3 %v772_v0  ;;  %v767_v5 = vld [vmem:[%s1137_s26 + $0x10] sm:$0xff]  ;;  %v766_v6 = vld [vmem:[%s1137_s26 + $0x8] sm:$0xff]  ;;  %v765_v7 = vld [vmem:[%s1137_s26] sm:$0xff]  ;;  %s552_s18 = sshll.u32 %s1160_s27, 4  ;;  %s554_s12 = sshll.u32 %s551_s16, 4  ;;  %s553_s18 = int_to_ptr.vmem [resolvable:$true] %s552_s18  ;;  %s555_s12 = int_to_ptr.hbm [resolvable:$true] %s554_s12 }
  0x2a   : > { %v757_v8 = vld [vmem:[%s1130_s7] sm:$0xff]  ;;  %v759_v9 = vld [vmem:[%s1130_s7 + $0x10] sm:$0xff]  ;;  %v758_v12 = vld [vmem:[%s1130_s7 + $0x8] sm:$0xff]  ;;  %s538_s20 = scalar_lea.sflag [#allocation5], %s1126_s3  ;;  %s943_s28 = sshra.s32 %s555_s12, 4  ;;  %s944_s28 = int_to_ptr.hbm [resolvable:$true] %s943_s28 }
  0x2b   : > { %v761_v10 = vld [vmem:[%s1130_s7 + $0x20] sm:$0xff]  ;;  %v763_v11 = vld [vmem:[%s1130_s7 + $0x30] sm:$0xff]  ;;  %v760_v13 = vld [vmem:[%s1130_s7 + $0x18] sm:$0xff]  ;;  %s945_s19 = scalar_lea.hbm %s944_s28, 128  ;;  %s949_s4 = scalar_lea.hbm %s1219_s2, 256 }
  0x2c   : > { %406 = vmatpush.bf16.msra.mxu0 %v771_v1  ;;  %777 = vmatpush.bf16.msra.mxu1 %v771_v1  ;;  %v762_v14 = vld [vmem:[%s1130_s7 + $0x28] sm:$0xff]  ;;  %v764_v15 = vld [vmem:[%s1130_s7 + $0x38] sm:$0xff]  ;;  %p946_p4 = scmp.ne.s32.totalorder %s944_s28, %s945_s19  ;;  %p950_p7 = scmp.lt.s32.totalorder %s944_s28, %s1219_s2 }
  0x2d   : > { %778 = vmatpush.bf16.msra.mxu2 %v771_v1  ;;  %779 = vmatpush.bf16.msra.mxu3 %v771_v1  ;;  %p951_p8 = scmp.lt.s32.totalorder %s949_s4, %s945_s19 }
  0x2e   : > { %p947_p5 = pnand %p946_p4, %p1087_p9 }
  0x2f   : > { %p952_p10 = por %p951_p8, %p950_p7 }
  0x30   : > { %407 = vmatpush.bf16.msra.mxu0 %v770_v2  ;;  %780 = vmatpush.bf16.msra.mxu1 %v770_v2  ;;  %p948_p6 = pneg %p947_p5 }
  0x31   : > { %781 = vmatpush.bf16.msra.mxu2 %v770_v2  ;;  %782 = vmatpush.bf16.msra.mxu3 %v770_v2 }
  0x32   : > { %p953_p13 = pnand %p952_p10, %p948_p6 }
  0x34   : > { %408 = vmatpush.bf16.msra.mxu0 %v769_v3  ;;  %783 = vmatpush.bf16.msra.mxu1 %v769_v3 }
  0x35   : > { %784 = vmatpush.bf16.msra.mxu2 %v769_v3  ;;  %785 = vmatpush.bf16.msra.mxu3 %v769_v3 }
  0x38   : > { %409 = vmatpush.bf16.msra.mxu0 %v768_v4  ;;  %786 = vmatpush.bf16.msra.mxu1 %v768_v4 }
  0x39   : > { %787 = vmatpush.bf16.msra.mxu2 %v768_v4  ;;  %788 = vmatpush.bf16.msra.mxu3 %v768_v4 }
  0x3c   : > { %410 = vmatpush.bf16.msra.mxu0 %v767_v5  ;;  %789 = vmatpush.bf16.msra.mxu1 %v767_v5 }
  0x3d   : > { %790 = vmatpush.bf16.msra.mxu2 %v767_v5  ;;  %791 = vmatpush.bf16.msra.mxu3 %v767_v5 }
  0x40   : > { %411 = vmatpush.bf16.msra.mxu0 %v766_v6  ;;  %792 = vmatpush.bf16.msra.mxu1 %v766_v6 }
  0x41   : > { %793 = vmatpush.bf16.msra.mxu2 %v766_v6  ;;  %794 = vmatpush.bf16.msra.mxu3 %v766_v6 }
  0x44   : > { %412 = vmatpush.bf16.msra.mxu0 %v765_v7  ;;  %795 = vmatpush.bf16.msra.mxu1 %v765_v7 }
  0x45   : > { %796 = vmatpush.bf16.msra.mxu2 %v765_v7  ;;  %797 = vmatpush.bf16.msra.mxu3 %v765_v7 }
  0x47   : > { %413 = vmatmul.bf16.vlgmr.msra.gmra.mxu0 %v757_v8  ;;  %423 = vmatmul.bf16.vlgmr.msra.gmra.mxu1 %v759_v9 }
  0x48   : > { %433 = vmatmul.bf16.vlgmr.msra.gmra.mxu2 %v761_v10  ;;  %443 = vmatmul.bf16.vlgmr.msra.gmra.mxu3 %v763_v11 }
  0x57   : > { %418 = vmatmul.bf16.gmra.mxu0 %v758_v12  ;;  %428 = vmatmul.bf16.gmra.mxu1 %v760_v13 }
  0x58   : > { %438 = vmatmul.bf16.gmra.mxu2 %v762_v14  ;;  %448 = vmatmul.bf16.gmra.mxu3 %v764_v15 }
  0xc4   : > { %v414_v16 = vpop.f32.mrf.mxu0  ;;  %v424_v17 = vpop.f32.mrf.mxu1 }
  0xc5   : > { %v505_v18 = vmax.f32 %v414_v16, 0.0  ;;  %v509_v19 = vmax.f32 %v424_v17, 0.0 }
  0xc7   : > { %521 = vst [vmem:[%s1160_s27] sm:$0xff] %v505_v18 }
  0xc8   : > { %525 = vst [vmem:[%s1160_s27 + $0x20] sm:$0xff] %v509_v19 }
  0xcb   : > { %v434_v20 = vpop.f32.mrf.mxu2  ;;  %v444_v21 = vpop.f32.mrf.mxu3 }
  0xcc   : > { %v513_v22 = vmax.f32 %v434_v20, 0.0  ;;  %v517_v23 = vmax.f32 %v444_v21, 0.0  ;;  %v416_v24 = vpop.f32.mrf.mxu0  ;;  %v426_v25 = vpop.f32.mrf.mxu1 }
  0xcd   : > { %v506_v26 = vmax.f32 %v416_v24, 0.0  ;;  %v510_v27 = vmax.f32 %v426_v25, 0.0 }
  0xce   : > { %529 = vst [vmem:[%s1160_s27 + $0x40] sm:$0xff] %v513_v22 }
  0xcf   : > { %533 = vst [vmem:[%s1160_s27 + $0x60] sm:$0xff] %v517_v23 }
  0xd0   : > { %522 = vst [vmem:[%s1160_s27 + $0x8] sm:$0xff] %v506_v26 }
  0xd1   : > { %526 = vst [vmem:[%s1160_s27 + $0x28] sm:$0xff] %v510_v27 }
  0xd3   : > { %v436_v28 = vpop.f32.mrf.mxu2  ;;  %v446_v29 = vpop.f32.mrf.mxu3 }
  0xd4   : > { %v514_v30 = vmax.f32 %v436_v28, 0.0  ;;  %v518_v31 = vmax.f32 %v446_v29, 0.0  ;;  %v419_v32 = vpop.f32.mrf.mxu0  ;;  %v429_v33 = vpop.f32.mrf.mxu1 }
  0xd5   : > { %v507_v34 = vmax.f32 %v419_v32, 0.0  ;;  %v511_v35 = vmax.f32 %v429_v33, 0.0 }
  0xd6   : > { %530 = vst [vmem:[%s1160_s27 + $0x48] sm:$0xff] %v514_v30 }
  0xd7   : > { %534 = vst [vmem:[%s1160_s27 + $0x68] sm:$0xff] %v518_v31 }
  0xd8   : > { %523 = vst [vmem:[%s1160_s27 + $0x10] sm:$0xff] %v507_v34 }
  0xd9   : > { %527 = vst [vmem:[%s1160_s27 + $0x30] sm:$0xff] %v511_v35 }
  0xdb   : > { %v439_v36 = vpop.f32.mrf.mxu2  ;;  %v449_v37 = vpop.f32.mrf.mxu3 }
  0xdc   : > { %v515_v38 = vmax.f32 %v439_v36, 0.0  ;;  %v519_v39 = vmax.f32 %v449_v37, 0.0  ;;  %v421_v40 = vpop.f32.mrf.mxu0  ;;  %v431_v41 = vpop.f32.mrf.mxu1 }
  0xdd   : > { %v508_v42 = vmax.f32 %v421_v40, 0.0  ;;  %v512_v43 = vmax.f32 %v431_v41, 0.0 }
  0xde   : > { %531 = vst [vmem:[%s1160_s27 + $0x50] sm:$0xff] %v515_v38 }
  0xdf   : > { %535 = vst [vmem:[%s1160_s27 + $0x70] sm:$0xff] %v519_v39 }
  0xe0   : > { %524 = vst [vmem:[%s1160_s27 + $0x18] sm:$0xff] %v508_v42 }
  0xe1   : > { %528 = vst [vmem:[%s1160_s27 + $0x38] sm:$0xff] %v512_v43 }
  0xe3   : > { %v441_v44 = vpop.f32.mrf.mxu2  ;;  %v451_v45 = vpop.f32.mrf.mxu3 }
  0xe4   : > { %v516_v46 = vmax.f32 %v441_v44, 0.0  ;;  %v520_v47 = vmax.f32 %v451_v45, 0.0 }
  0xe6   : > { %532 = vst [vmem:[%s1160_s27 + $0x58] sm:$0xff] %v516_v46 }
  0xe7   : > { %536 = vst [vmem:[%s1160_s27 + $0x78] sm:$0xff] %v520_v47 }
  0xe8   : > { %956 = shalt.err (!%p953_p13)
}
  0xe9   : > { %s1019_s3 = smov 128   ;;  %s1020_s25 = smov 8  }
  0xea   : > { %802 = dma.vmem_to_hbm [thread:$0]  (%p1087_p9), %s553_s18, 2048, %s555_s12, %s538_s20, %s1019_s3, %s1019_s3, %s1020_s25  }
  0xeb PF: > { %s569_s26 = sand.u32 1, %s995_s9   ;;  %p812_p0 = pnand %p675_p12, %p1094_p11 }
  0xec   : > { %s570_s21 = scalar_lea.sflag [#allocation5], %s569_s26 }
  0xed   : > { %p813_p1 = pneg %p812_p0 }
  0xef   : > { %990 = dma.done.wait (%p813_p1), %s570_s21, 2048  }
  0xf0   : > { %992 = vsyncadd (%p813_p1), %s570_s21, 4294965248  ;;  %s21_s14 = sadd.s32 1, %s1015_s14   ;;  %s1225_s9 = smov %s999_s10 }
  0xf1   : > { %p18_p2 = scmp.ge.s32.totalorder %s21_s14, 4   ;;  %s1226_s10 = smov %s1003_s11 }
  0xf2   : > { %s1227_s11 = smov %s1092_s23  ;;  %s1228_s12 = smov %s1011_s13 }
  0xf3   : > { %s1229_s13 = smov %s1231_s17  ;;  %20 = sbr.rel (!%p18_p2) target bundleno = 8 (0x8), region = 94 }
  0xf8   :  { %576 = vsyncpa [#allocation4], 1 }
  0xf9   :  { %578 = vsyncpa [#allocation4 + $0x1], 1 }
  0xfa   :  { %579 = vsyncpa [#allocation7], 1 }
  0xfb   :  { %581 = vsyncpa [#allocation7 + $0x1], 1 }
  0xfc   :  { %582 = vsyncpa [#allocation5], 1 }
  0xfd   :  { %584 = vsyncpa [#allocation5 + $0x1], 1 }

</bundles_post_ra>
